<compile_context>
chip_gen: v6e
topology: v6e:2x2x1
jax: 0.10.0
libtpu: 0.0.40
codegen_flags: <defaults>
</compile_context>

<pallas_src>
import numpy as np
import jax
import jax.numpy as jnp
from jax import lax
from jax.experimental import pallas as pl
from jax.experimental.pallas import tpu as pltpu


def _round_up(x, m):
    return ((x + m - 1) // m) * m


# ----------------------------------------------------------------------------
# Deterministic camera extrinsics / intrinsics (stand-in for the abstract
# compute_vertices_camera / compute_vertices_image methods).
# ----------------------------------------------------------------------------
def _make_camera_params(height, width):
    ang = 0.3
    R = np.array(
        [[np.cos(ang), 0.0, np.sin(ang)],
         [0.0, 1.0, 0.0],
         [-np.sin(ang), 0.0, np.cos(ang)]], dtype=np.float32)
    T = np.array([0.0, 0.0, -3.0], dtype=np.float32)   # push scene in front of camera
    fx = float(width)
    fy = float(height)
    cx = float(width) * 0.5
    cy = float(height) * 0.5
    return R, T, fx, fy, cx, cy


# ----------------------------------------------------------------------------
# Plane-major (C, S, 128) padding helper so elementwise kernels see full
# (8,128) vregs and can be tiled along the lane-block axis.
# ----------------------------------------------------------------------------
_MAX_TS = 256          # sublane-rows per grid step for the elementwise kernels


def _plane_pad(x2d):
    """(C, N) -> ((C, S, 128), S, TS) with S % TS == 0 and TS % 8 == 0."""
    C, N = x2d.shape
    s_needed = max(1, -(-N // 128))
    if s_needed <= _MAX_TS:
        S = _round_up(s_needed, 8)
        TS = S
    else:
        S = _round_up(s_needed, _MAX_TS)
        TS = _MAX_TS
    NP = S * 128
    xp = jnp.pad(x2d, ((0, 0), (0, NP - N)))
    return xp.reshape(C, S, 128), S, TS


# ----------------------------------------------------------------------------
# Kernel 1: compute_vertices_camera + compute_vertices_image
# Blocks: (3, TS, 128) in, (3, TS, 128) + (2, TS, 128) out; each coordinate
# plane is a dense (TS, 128) tile.
# ----------------------------------------------------------------------------
def _make_camera_kernel(R, T, fx, fy, cx, cy):
    R = [[float(R[i, j]) for j in range(3)] for i in range(3)]
    T = [float(t) for t in T]

    def kernel(v_ref, cam_ref, img_ref):
        x = v_ref[0]                                   # (TS, 128) full vregs
        y = v_ref[1]
        z = v_ref[2]
        xc = x * R[0][0] + y * R[0][1] + z * R[0][2] + T[0]
        yc = x * R[1][0] + y * R[1][1] + z * R[1][2] + T[1]
        zc = x * R[2][0] + y * R[2][1] + z * R[2][2] + T[2]
        cam_ref[0] = xc
        cam_ref[1] = yc
        cam_ref[2] = zc
        # near-plane guard; exact f32 divide (approx reciprocal can flip
        # coverage decisions right at triangle edges).
        inv_negz = 1.0 / jnp.maximum(-zc, 1e-6)
        img_ref[0] = xc * inv_negz * fx + cx
        img_ref[1] = yc * inv_negz * fy + cy

    return kernel


def camera_project(vertices, height, width):
    """vertices (B,V,3) -> plane-major vs_camera (3,B,V), vs_image (2,B,V)."""
    B, V, _ = vertices.shape
    N = B * V
    R, T, fx, fy, cx, cy = _make_camera_params(height, width)
    kernel = _make_camera_kernel(R, T, fx, fy, cx, cy)

    verts_p = vertices.transpose(2, 0, 1).reshape(3, N)        # one transpose in
    planes, S, TS = _plane_pad(verts_p)
    cam_pl, img_pl = pl.pallas_call(
        kernel,
        out_shape=(jax.ShapeDtypeStruct((3, S, 128), jnp.float32),
                   jax.ShapeDtypeStruct((2, S, 128), jnp.float32)),
        grid=(S // TS,),
        in_specs=[pl.BlockSpec((3, TS, 128), lambda i: (0, i, 0))],
        out_specs=(pl.BlockSpec((3, TS, 128), lambda i: (0, i, 0)),
                   pl.BlockSpec((2, TS, 128), lambda i: (0, i, 0))),
        compiler_params=pltpu.CompilerParams(
            dimension_semantics=("parallel",)),
    )(planes)
    # stay in plane-major layout downstream (no back-transpose)
    vs_camera_p = cam_pl.reshape(3, S * 128)[:, :N].reshape(3, B, V)
    vs_image_p = img_pl.reshape(2, S * 128)[:, :N].reshape(2, B, V)
    return vs_camera_p, vs_image_p


# ----------------------------------------------------------------------------
# Kernel 2: face normals (cross product) + unit normals, plane-major.
# Inputs: the three face corners, each as (3, TS, 128) coordinate planes.
# ----------------------------------------------------------------------------
def face_normal_kernel(v0_ref, v1_ref, v2_ref, n_ref, nu_ref):
    e1x = v1_ref[0] - v0_ref[0]
    e1y = v1_ref[1] - v0_ref[1]
    e1z = v1_ref[2] - v0_ref[2]
    e2x = v2_ref[0] - v0_ref[0]
    e2y = v2_ref[1] - v0_ref[1]
    e2z = v2_ref[2] - v0_ref[2]
    nx = e1y * e2z - e1z * e2y
    ny = e1z * e2x - e1x * e2z
    nz = e1x * e2y - e1y * e2x
    n_ref[0] = nx
    n_ref[1] = ny
    n_ref[2] = nz
    inv = lax.rsqrt(nx * nx + ny * ny + nz * nz + 1e-20)
    nu_ref[0] = nx * inv
    nu_ref[1] = ny * inv
    nu_ref[2] = nz * inv


def compute_face_normals(v0_p, v1_p, v2_p):
    """v*_p: (3, B, F) plane-major face corner camera coords.
       Returns face_normals, unit normals, both (3, B, F) plane-major."""
    _, B, F = v0_p.shape
    M = B * F
    p0, S, TS = _plane_pad(v0_p.reshape(3, M))
    p1, _, _ = _plane_pad(v1_p.reshape(3, M))
    p2, _, _ = _plane_pad(v2_p.reshape(3, M))
    spec3 = pl.BlockSpec((3, TS, 128), lambda i: (0, i, 0))
    fn_pl, fnu_pl = pl.pallas_call(
        face_normal_kernel,
        out_shape=(jax.ShapeDtypeStruct((3, S, 128), jnp.float32),
                   jax.ShapeDtypeStruct((3, S, 128), jnp.float32)),
        grid=(S // TS,),
        in_specs=[spec3, spec3, spec3],
        out_specs=(spec3, spec3),
        compiler_params=pltpu.CompilerParams(
            dimension_semantics=("parallel",)),
    )(p0, p1, p2)
    fn_p = fn_pl.reshape(3, S * 128)[:, :M].reshape(3, B, F)
    fnu_p = fnu_pl.reshape(3, S * 128)[:, :M].reshape(3, B, F)
    return fn_p, fnu_p


# ----------------------------------------------------------------------------
# Kernel 3: rasterization core (dibr_rasterization stand-in).
# Per (batch, row-tile, col-tile):
#   phase 1: scalar-only cull over all faces (SMEM), compact survivors into
#            an SMEM face-id list.
#   phase 2: fori_loop over survivors only; best-z / w0 / w1 / idx are carried
#            in vregs; the (tile_h, 128) outputs are stored once at tile end.
# Attribute interpolation is deferred to a single gather+blend pass afterwards.
# ----------------------------------------------------------------------------
def raster_kernel(fz_s, fimg_s, fnz_s,
                  prob_ref, idx_ref, w0_ref, w1_ref,
                  flist, cnt):
    TH, TW = prob_ref.shape
    F = fnz_s.shape[1]
    b = pl.program_id(0)
    z_row = b * 3
    im_row = b * 6
    row0f = (pl.program_id(1) * TH).astype(jnp.float32)
    col0f = (pl.program_id(2) * TW).astype(jnp.float32)

    # ---------------- phase 1: scalar-only face culling --------------------
    cnt[0] = jnp.int32(0)

    @pl.loop(0, F)
    def _(f):
        nz = fnz_s[b, f]
        v0x = fimg_s[im_row + 0, f]
        v0y = fimg_s[im_row + 1, f]
        v1x = fimg_s[im_row + 2, f]
        v1y = fimg_s[im_row + 3, f]
        v2x = fimg_s[im_row + 4, f]
        v2y = fimg_s[im_row + 5, f]
        z0 = fz_s[z_row + 0, f]
        z1 = fz_s[z_row + 1, f]
        z2 = fz_s[z_row + 2, f]
        denom = (v1y - v2y) * (v0x - v2x) + (v2x - v1x) * (v0y - v2y)
        fxmin = jnp.minimum(jnp.minimum(v0x, v1x), v2x)
        fxmax = jnp.maximum(jnp.maximum(v0x, v1x), v2x)
        fymin = jnp.minimum(jnp.minimum(v0y, v1y), v2y)
        fymax = jnp.maximum(jnp.maximum(v0y, v1y), v2y)
        in_tile = ((fxmax >= col0f) & (fxmin <= col0f + TW) &
                   (fymax >= row0f) & (fymin <= row0f + TH))
        # TODO(synk): no proper near-plane clipping; faces with any vertex at
        # or behind the camera plane are culled outright.
        in_front = (z0 < -1e-5) & (z1 < -1e-5) & (z2 < -1e-5)
        # TODO(synk): back-face culling assumes the winding / camera-looks-
        # along--z convention of the deterministic camera above.
        keep = (nz > 0.0) & (jnp.abs(denom) > 1e-8) & in_tile & in_front

        @pl.when(keep)
        def _():
            flist[cnt[0]] = f.astype(jnp.int32)
            cnt[0] = cnt[0] + 1

    # ---------------- phase 2: vector pass over surviving faces ------------
    py = row0f + lax.broadcasted_iota(jnp.float32, (TH, TW), 0) + 0.5
    px = col0f + lax.broadcasted_iota(jnp.float32, (TH, TW), 1) + 0.5

    def body(i, carry):
        best_z, acc_w0, acc_w1, acc_idx = carry
        fid = flist[i]
        v0x = fimg_s[im_row + 0, fid]
        v0y = fimg_s[im_row + 1, fid]
        v1x = fimg_s[im_row + 2, fid]
        v1y = fimg_s[im_row + 3, fid]
        v2x = fimg_s[im_row + 4, fid]
        v2y = fimg_s[im_row + 5, fid]
        z0 = fz_s[z_row + 0, fid]
        z1 = fz_s[z_row + 1, fid]
        z2 = fz_s[z_row + 2, fid]
        denom = (v1y - v2y) * (v0x - v2x) + (v2x - v1x) * (v0y - v2y)
        inv_denom = 1.0 / denom
        w0 = ((v1y - v2y) * (px - v2x) + (v2x - v1x) * (py - v2y)) * inv_denom
        w1 = ((v2y - v0y) * (px - v2x) + (v0x - v2x) * (py - v2y)) * inv_denom
        w2 = 1.0 - w0 - w1
        inside = (w0 >= 0.0) & (w1 >= 0.0) & (w2 >= 0.0)
        # TODO(synk): screen-space (affine) interpolation, not perspective-correct.
        z = w0 * z0 + w1 * z1 + w2 * z2
        upd = inside & (z > best_z)
        best_z = jnp.where(upd, z, best_z)
        acc_w0 = jnp.where(upd, w0, acc_w0)
        acc_w1 = jnp.where(upd, w1, acc_w1)
        acc_idx = jnp.where(upd, fid, acc_idx)
        return best_z, acc_w0, acc_w1, acc_idx

    init = (jnp.full((TH, TW), -jnp.inf, jnp.float32),
            jnp.zeros((TH, TW), jnp.float32),
            jnp.zeros((TH, TW), jnp.float32),
            jnp.full((TH, TW), -1, jnp.int32))
    _, acc_w0, acc_w1, acc_idx = lax.fori_loop(0, cnt[0], body, init)

    # single, unmasked lane-dense stores per output at tile end
    idx_ref[...] = acc_idx
    w0_ref[...] = acc_w0
    w1_ref[...] = acc_w1
    # TODO(synk): kaolin DIBR computes a *soft* sigmoid-of-distance probability
    # map; improb here is the hard coverage mask.
    prob_ref[...] = (acc_idx >= 0).astype(jnp.float32)


def rasterize(fz_smem, fimg_smem, fnz_smem, height, width,
              tile_h=16, tile_w=128):
    """fz_smem: (B*3,F) camera z per face vertex; fimg_smem: (B*6,F) image xy;
    fnz_smem: (B,F) unit-normal z.  Returns improb, imdx, w0, w1 (B,H,W)."""
    B, F = fnz_smem.shape
    # Pad W to a multiple of 128 and H to a multiple of tile_h so every store
    # is an unmasked (tile_h, 128) store; crop back in XLA afterwards.
    Hp = _round_up(height, tile_h)
    Wp = _round_up(width, tile_w)
    # v7x has 2 TensorCores: make sure the grid has at least 2 points.
    if B * (Hp // tile_h) * (Wp // tile_w) < 2:
        Hp = 2 * tile_h
    grid = (B, Hp // tile_h, Wp // tile_w)

    smem_spec = pl.BlockSpec(memory_space=pltpu.MemorySpace.SMEM)
    out_spec = pl.BlockSpec((None, tile_h, tile_w), lambda b, r, c: (b, r, c))
    improb, imdx, w0, w1 = pl.pallas_call(
        raster_kernel,
        out_shape=(jax.ShapeDtypeStruct((B, Hp, Wp), jnp.float32),
                   jax.ShapeDtypeStruct((B, Hp, Wp), jnp.int32),
                   jax.ShapeDtypeStruct((B, Hp, Wp), jnp.float32),
                   jax.ShapeDtypeStruct((B, Hp, Wp), jnp.float32)),
        grid=grid,
        in_specs=[smem_spec, smem_spec, smem_spec],
        out_specs=(out_spec, out_spec, out_spec, out_spec),
        scratch_shapes=[pltpu.SMEM((F,), jnp.int32),     # compacted face ids
                        pltpu.SMEM((1,), jnp.int32)],    # surviving-face count
        compiler_params=pltpu.CompilerParams(
            dimension_semantics=("parallel", "parallel", "parallel")),
    )(fz_smem, fimg_smem, fnz_smem)
    return (improb[:, :height, :width], imdx[:, :height, :width],
            w0[:, :height, :width], w1[:, :height, :width])


# ----------------------------------------------------------------------------
# Glue: full BaseKaolinRenderer.forward
# ----------------------------------------------------------------------------
def kaolin_render_forward(vertices, faces, height, width,
                          smooth_normals=True, attribs=None):
    B, V, _ = vertices.shape
    F = faces.shape[0]
    f0, f1, f2 = faces[:, 0], faces[:, 1], faces[:, 2]

    # compute_vertices_camera / compute_vertices_image (Pallas, plane-major)
    vs_camera_p, vs_image_p = camera_project(vertices, height, width)

    # index_vertices_by_faces: per-corner gathers keep the plane-major layout
    # (no back-transpose of the mem-bound vertex arrays).
    v0 = vs_camera_p[:, :, f0]          # (3, B, F)
    v1 = vs_camera_p[:, :, f1]
    v2 = vs_camera_p[:, :, f2]
    i0 = vs_image_p[:, :, f0]           # (2, B, F)
    i1 = vs_image_p[:, :, f1]
    i2 = vs_image_p[:, :, f2]

    # face normals (Pallas, sublane+lane dense, plane-major)
    fn_p, fnu_p = compute_face_normals(v0, v1, v2)
    # The reference's unsqueeze(-2).repeat(1,1,3,1)[:, :, 1] equals the unit
    # normal itself; only its z component is needed for culling.
    face_nz = fnu_p[2]                  # (B, F)

    face_attributes = []
    if smooth_normals:
        # compute_normals_per_vertex: sparse scatter-add (no dense one-hot matmul)
        vn_p = jnp.zeros((3, B, V), jnp.float32)
        vn_p = (vn_p.at[:, :, f0].add(fn_p)
                     .at[:, :, f1].add(fn_p)
                     .at[:, :, f2].add(fn_p))
        vn_p = vn_p * lax.rsqrt(jnp.sum(vn_p * vn_p, axis=0, keepdims=True) + 1e-12)
        fvn = jnp.stack([vn_p[:, :, f0], vn_p[:, :, f1], vn_p[:, :, f2]], axis=0)
        face_attributes.append(fvn.transpose(2, 3, 0, 1))          # (B, F, 3, 3)
    else:
        fnu = fnu_p.transpose(1, 2, 0)                              # (B, F, 3)
        face_attributes.append(jnp.repeat(fnu[:, :, None, :], 3, axis=2))
    if attribs is not None:
        face_attributes.extend(list(attribs))

    channels = [a.shape[-1] for a in face_attributes]
    csum = sum(channels)
    attr_cat = jnp.concatenate(face_attributes, axis=-1)            # (B, F, 3, C)

    # SMEM face tables (long face axis last keeps SMEM padding small)
    fz_smem = jnp.stack([v0[2], v1[2], v2[2]], axis=1).reshape(B * 3, F)
    fimg_smem = jnp.stack([i0[0], i0[1], i1[0], i1[1], i2[0], i2[1]],
                          axis=1).reshape(B * 6, F)

    # rasterization core (Pallas)
    improb, imdx, w0, w1 = rasterize(fz_smem, fimg_smem, face_nz, height, width)

    # deferred attribute interpolation: one gather + blend pass
    # TODO(synk): could be fused into a Pallas epilogue for very large images.
    covered = imdx >= 0
    safe_idx = jnp.where(covered, imdx, 0).reshape(B, height * width)
    gathered = jax.vmap(lambda a, i: a[i])(attr_cat, safe_idx)       # (B, HW, 3, C)
    gathered = gathered.reshape(B, height, width, 3, csum)
    w2 = 1.0 - w0 - w1
    imfeat = (w0[..., None] * gathered[..., 0, :]
              + w1[..., None] * gathered[..., 1, :]
              + w2[..., None] * gathered[..., 2, :])
    imfeat = jnp.where(covered[..., None], imfeat, 0.0)              # (B, H, W, C)

    rendered = []
    off = 0
    for c in channels:
        rendered.append(imfeat[..., off:off + c])
        off += c

    if smooth_normals:
        imnormal, *rendered_attribs = rendered
        imnormal = imnormal / (jnp.linalg.norm(imnormal, axis=3, keepdims=True)
                               + 1e-10)
        return (imnormal, *rendered_attribs), improb, imdx
    return tuple(rendered), improb, imdx


# ----------------------------------------------------------------------------
if __name__ == "__main__":
    B, V, F, H, W = 2, 16, 16, 16, 16

    key = jax.random.PRNGKey(0)
    kv, _ = jax.random.split(key)
    vertices = jax.random.normal(kv, (B, V, 3), dtype=jnp.float32) * 0.5

    # deterministic, non-degenerate faces (distinct vertex indices per face)
    idx = np.arange(F)
    faces = jnp.asarray(
        np.stack([idx % V, (idx + 1) % V, (idx + 5) % V], axis=1), dtype=jnp.int32)

    result = kaolin_render_forward(vertices, faces, H, W, smooth_normals=True)
    result = jax.block_until_ready(result)

    (imnormal, *rest), improb, imdx = result
    assert imnormal.shape == (B, H, W, 3)
    assert improb.shape == (B, H, W)
    assert imdx.shape == (B, H, W) and imdx.dtype == jnp.int32
    assert np.isfinite(np.asarray(imnormal)).all()
    print("KERNEL_OK")
</pallas_src>

<mosaic_0001>
module attributes {stable_mosaic.version = 11 : i64} {
  func.func @kernel(%arg0: i32, %arg1: memref<3x8x128xf32, #tpu.memory_space<vmem>>, %arg2: memref<3x8x128xf32, #tpu.memory_space<vmem>>, %arg3: memref<2x8x128xf32, #tpu.memory_space<vmem>>) attributes {dimension_semantics = [#tpu.dimension_semantics<parallel>], iteration_bounds = array<i64: 1>, scalar_prefetch = 0 : i64, scratch_operands = 0 : i64, tpu.core_type = #tpu.core_type<tc>, window_params = [{transform_indices = @transform_0, window_bounds = array<i64: 3, 8, 128>}, {transform_indices = @transform_1, window_bounds = array<i64: 3, 8, 128>}, {transform_indices = @transform_2, window_bounds = array<i64: 2, 8, 128>}]} {
    %c0 = arith.constant 0 : index
    %c0_0 = arith.constant 0 : index
    %c0_1 = arith.constant 0 : index
    %0 = vector.load %arg1[%c0, %c0_0, %c0_1] : memref<3x8x128xf32, #tpu.memory_space<vmem>>, vector<1x8x128xf32>
    %1 = vector.shape_cast %0 : vector<1x8x128xf32> to vector<8x128xf32>
    %c1 = arith.constant 1 : index
    %c0_2 = arith.constant 0 : index
    %c0_3 = arith.constant 0 : index
    %2 = vector.load %arg1[%c1, %c0_2, %c0_3] : memref<3x8x128xf32, #tpu.memory_space<vmem>>, vector<1x8x128xf32>
    %3 = vector.shape_cast %2 : vector<1x8x128xf32> to vector<8x128xf32>
    %c2 = arith.constant 2 : index
    %c0_4 = arith.constant 0 : index
    %c0_5 = arith.constant 0 : index
    %4 = vector.load %arg1[%c2, %c0_4, %c0_5] : memref<3x8x128xf32, #tpu.memory_space<vmem>>, vector<1x8x128xf32>
    %5 = vector.shape_cast %4 : vector<1x8x128xf32> to vector<8x128xf32>
    %cst = arith.constant 0.955336511 : f32
    %6 = vector.broadcast %cst : f32 to vector<8x128xf32>
    %7 = arith.mulf %1, %6 : vector<8x128xf32>
    %cst_6 = arith.constant 0.000000e+00 : f32
    %8 = vector.broadcast %cst_6 : f32 to vector<8x128xf32>
    %9 = arith.mulf %3, %8 : vector<8x128xf32>
    %10 = arith.addf %7, %9 : vector<8x128xf32>
    %cst_7 = arith.constant 0.295520216 : f32
    %11 = vector.broadcast %cst_7 : f32 to vector<8x128xf32>
    %12 = arith.mulf %5, %11 : vector<8x128xf32>
    %13 = arith.addf %10, %12 : vector<8x128xf32>
    %cst_8 = arith.constant 0.000000e+00 : f32
    %14 = vector.broadcast %cst_8 : f32 to vector<8x128xf32>
    %15 = arith.addf %13, %14 : vector<8x128xf32>
    %cst_9 = arith.constant 0.000000e+00 : f32
    %16 = vector.broadcast %cst_9 : f32 to vector<8x128xf32>
    %17 = arith.mulf %1, %16 : vector<8x128xf32>
    %cst_10 = arith.constant 1.000000e+00 : f32
    %18 = vector.broadcast %cst_10 : f32 to vector<8x128xf32>
    %19 = arith.mulf %3, %18 : vector<8x128xf32>
    %20 = arith.addf %17, %19 : vector<8x128xf32>
    %cst_11 = arith.constant 0.000000e+00 : f32
    %21 = vector.broadcast %cst_11 : f32 to vector<8x128xf32>
    %22 = arith.mulf %5, %21 : vector<8x128xf32>
    %23 = arith.addf %20, %22 : vector<8x128xf32>
    %cst_12 = arith.constant 0.000000e+00 : f32
    %24 = vector.broadcast %cst_12 : f32 to vector<8x128xf32>
    %25 = arith.addf %23, %24 : vector<8x128xf32>
    %cst_13 = arith.constant -0.295520216 : f32
    %26 = vector.broadcast %cst_13 : f32 to vector<8x128xf32>
    %27 = arith.mulf %1, %26 : vector<8x128xf32>
    %cst_14 = arith.constant 0.000000e+00 : f32
    %28 = vector.broadcast %cst_14 : f32 to vector<8x128xf32>
    %29 = arith.mulf %3, %28 : vector<8x128xf32>
    %30 = arith.addf %27, %29 : vector<8x128xf32>
    %cst_15 = arith.constant 0.955336511 : f32
    %31 = vector.broadcast %cst_15 : f32 to vector<8x128xf32>
    %32 = arith.mulf %5, %31 : vector<8x128xf32>
    %33 = arith.addf %30, %32 : vector<8x128xf32>
    %cst_16 = arith.constant -3.000000e+00 : f32
    %34 = vector.broadcast %cst_16 : f32 to vector<8x128xf32>
    %35 = arith.addf %33, %34 : vector<8x128xf32>
    %c0_17 = arith.constant 0 : index
    %c0_18 = arith.constant 0 : index
    %c0_19 = arith.constant 0 : index
    %36 = vector.load %arg2[%c0_17, %c0_18, %c0_19] : memref<3x8x128xf32, #tpu.memory_space<vmem>>, vector<1x8x128xf32>
    %37 = vector.shape_cast %36 : vector<1x8x128xf32> to vector<8x128xf32>
    %38 = vector.shape_cast %15 : vector<8x128xf32> to vector<1x8x128xf32>
    tpu.vector_store %arg2[%c0_17, %c0_18, %c0_19], %38 {strides = array<i32>} : memref<3x8x128xf32, #tpu.memory_space<vmem>>, vector<1x8x128xf32>,
    %c1_20 = arith.constant 1 : index
    %c0_21 = arith.constant 0 : index
    %c0_22 = arith.constant 0 : index
    %39 = vector.load %arg2[%c1_20, %c0_21, %c0_22] : memref<3x8x128xf32, #tpu.memory_space<vmem>>, vector<1x8x128xf32>
    %40 = vector.shape_cast %39 : vector<1x8x128xf32> to vector<8x128xf32>
    %41 = vector.shape_cast %25 : vector<8x128xf32> to vector<1x8x128xf32>
    tpu.vector_store %arg2[%c1_20, %c0_21, %c0_22], %41 {strides = array<i32>} : memref<3x8x128xf32, #tpu.memory_space<vmem>>, vector<1x8x128xf32>,
    %c2_23 = arith.constant 2 : index
    %c0_24 = arith.constant 0 : index
    %c0_25 = arith.constant 0 : index
    %42 = vector.load %arg2[%c2_23, %c0_24, %c0_25] : memref<3x8x128xf32, #tpu.memory_space<vmem>>, vector<1x8x128xf32>
    %43 = vector.shape_cast %42 : vector<1x8x128xf32> to vector<8x128xf32>
    %44 = vector.shape_cast %35 : vector<8x128xf32> to vector<1x8x128xf32>
    tpu.vector_store %arg2[%c2_23, %c0_24, %c0_25], %44 {strides = array<i32>} : memref<3x8x128xf32, #tpu.memory_space<vmem>>, vector<1x8x128xf32>,
    %cst_26 = arith.constant 0.000000e+00 : f32
    %45 = vector.broadcast %cst_26 : f32 to vector<8x128xf32>
    %46 = arith.subf %45, %35 : vector<8x128xf32>
    %cst_27 = arith.constant 9.99999997E-7 : f32
    %47 = vector.broadcast %cst_27 : f32 to vector<8x128xf32>
    %48 = arith.maximumf %46, %47 : vector<8x128xf32>
    %cst_28 = arith.constant 1.000000e+00 : f32
    %49 = vector.broadcast %cst_28 : f32 to vector<8x128xf32>
    %50 = arith.divf %49, %48 : vector<8x128xf32>
    %51 = arith.mulf %15, %50 : vector<8x128xf32>
    %cst_29 = arith.constant 1.600000e+01 : f32
    %52 = vector.broadcast %cst_29 : f32 to vector<8x128xf32>
    %53 = arith.mulf %51, %52 : vector<8x128xf32>
    %cst_30 = arith.constant 8.000000e+00 : f32
    %54 = vector.broadcast %cst_30 : f32 to vector<8x128xf32>
    %55 = arith.addf %53, %54 : vector<8x128xf32>
    %c0_31 = arith.constant 0 : index
    %c0_32 = arith.constant 0 : index
    %c0_33 = arith.constant 0 : index
    %56 = vector.load %arg3[%c0_31, %c0_32, %c0_33] : memref<2x8x128xf32, #tpu.memory_space<vmem>>, vector<1x8x128xf32>
    %57 = vector.shape_cast %56 : vector<1x8x128xf32> to vector<8x128xf32>
    %58 = vector.shape_cast %55 : vector<8x128xf32> to vector<1x8x128xf32>
    tpu.vector_store %arg3[%c0_31, %c0_32, %c0_33], %58 {strides = array<i32>} : memref<2x8x128xf32, #tpu.memory_space<vmem>>, vector<1x8x128xf32>,
    %59 = arith.mulf %25, %50 : vector<8x128xf32>
    %cst_34 = arith.constant 1.600000e+01 : f32
    %60 = vector.broadcast %cst_34 : f32 to vector<8x128xf32>
    %61 = arith.mulf %59, %60 : vector<8x128xf32>
    %cst_35 = arith.constant 8.000000e+00 : f32
    %62 = vector.broadcast %cst_35 : f32 to vector<8x128xf32>
    %63 = arith.addf %61, %62 : vector<8x128xf32>
    %c1_36 = arith.constant 1 : index
    %c0_37 = arith.constant 0 : index
    %c0_38 = arith.constant 0 : index
    %64 = vector.load %arg3[%c1_36, %c0_37, %c0_38] : memref<2x8x128xf32, #tpu.memory_space<vmem>>, vector<1x8x128xf32>
    %65 = vector.shape_cast %64 : vector<1x8x128xf32> to vector<8x128xf32>
    %66 = vector.shape_cast %63 : vector<8x128xf32> to vector<1x8x128xf32>
    tpu.vector_store %arg3[%c1_36, %c0_37, %c0_38], %66 {strides = array<i32>} : memref<2x8x128xf32, #tpu.memory_space<vmem>>, vector<1x8x128xf32>,
    return
  }
  func.func @transform_0(%arg0: i32) -> (i32, i32, i32) {
    %c0_i32 = arith.constant 0 : i32
    %c0_i32_0 = arith.constant 0 : i32
    %c0_i32_1 = arith.constant 0 : i32
    return %c0_i32, %arg0, %c0_i32_0 : i32, i32, i32
  }
  func.func @transform_1(%arg0: i32) -> (i32, i32, i32) {
    %c0_i32 = arith.constant 0 : i32
    %c0_i32_0 = arith.constant 0 : i32
    %c0_i32_1 = arith.constant 0 : i32
    return %c0_i32, %arg0, %c0_i32_0 : i32, i32, i32
  }
  func.func @transform_2(%arg0: i32) -> (i32, i32, i32) {
    %c0_i32 = arith.constant 0 : i32
    %c0_i32_0 = arith.constant 0 : i32
    %c0_i32_1 = arith.constant 0 : i32
    return %c0_i32, %arg0, %c0_i32_0 : i32, i32, i32
  }
}

</mosaic_0001>

<bundles_post_ra>
// kernel: tpu_custom_call.1
= control target key start
LH: loop header
LB: loop body
LE: loop exit
PB: predicated region body
PF: predicated region fallthrough
CT: control target
= control target key end

     0   :  { %8 = vsyncpa [#allocation3], 0  ;;  %s209_s0 = inlined_call_operand.hbm [shape: f32[3,8,128], index: 0, kind: input, shape index: {}]   ;;  %s210_s1 = inlined_call_operand.hbm [shape: f32[3,8,128], index: 1, kind: output, shape index: {0}]   ;;  %s211_s2 = inlined_call_operand.hbm [shape: f32[2,8,128], index: 2, kind: output, shape index: {1}]  }
   0x1   :  { %9 = vsyncpa [#allocation4], 0 }
   0x2   :  { %10 = vsyncpa [#allocation7], 0  ;;  %s171_s9 = smov [#allocation2]  }
   0x3   :  { %s16_s10 = sshll.u32 %s171_s9, 4  ;;  %s17_s10 = int_to_ptr.vmem [resolvable:$true] %s16_s10 }
   0x4   :  { %s113_s11 = scalar_lea.vmem %s17_s10, 384  ;;  %p118_p1 = scmp.lt.s32.totalorder %s17_s10, %s17_s10 }
   0x5   :  { %p114_p0 = scmp.ne.s32.totalorder %s17_s10, %s113_s11  ;;  %p119_p2 = scmp.lt.s32.totalorder %s113_s11, %s113_s11 }
   0x7   :  { %p120_p3 = por %p119_p2, %p118_p1 }
   0x9   :  { %p121_p4 = pnand %p120_p3, %p114_p0 }
   0xb   :  { %124 = shalt.err (!%p121_p4)
}
   0xc   :  { %s172_s12 = smov 128   ;;  %s173_s13 = smov 8  }
   0xd   :  { %22 = dma.hbm_to_vmem [thread:$0]  %s209_s0, 384, %s17_s10, [#allocation3], %s172_s12, %s172_s12, %s173_s13  }
   0xe   :  { %165 = dma.done.wait [#allocation3], 384  }
   0xf   :  { %166 = vsyncadd [#allocation3], 4294966912  ;;  %v26_v0 = vld [vmem:[#allocation2] sm:$0xff]  ;;  %v28_v1 = vld [vmem:[#allocation2 + $0x8] sm:$0xff]  ;;  %s174_s16 = smov [#allocation5]  }
  0x10   :  { %v30_v2 = vld [vmem:[#allocation2 + $0x10] sm:$0xff]  ;;  %v31_v3 = vmul.f32 0.9553365, %v26_v0  ;;  %v32_v4 = vmul.f32 0.0, %v28_v1  ;;  %v37_v6 = vmul.f32 0.0, %v26_v0  ;;  %s70_s17 = sshll.u32 %s174_s16, 4  ;;  %s71_s17 = int_to_ptr.vmem [resolvable:$true] %s70_s17 }
  0x11   :  { %v34_v5 = vmul.f32 0.29552022, %v30_v2  ;;  %v39_v7 = vmul.f32 0.0, %v30_v2  ;;  %v42_v8 = vmul.f32 -0.29552022, %v26_v0  ;;  %s125_s0 = scalar_lea.vmem %s71_s17, 384  ;;  %p130_p6 = scmp.lt.s32.totalorder %s71_s17, %s71_s17 }
  0x12   :  { %v44_v9 = vmul.f32 0.9553365, %v30_v2  ;;  %v33_v10 = vadd.f32 %v32_v4, %v31_v3  ;;  %v38_v11 = vadd.f32 %v37_v6, %v28_v1  ;;  %p126_p5 = scmp.ne.s32.totalorder %s71_s17, %s125_s0  ;;  %p131_p7 = scmp.lt.s32.totalorder %s125_s0, %s125_s0 }
  0x13   :  { %v43_v12 = vadd.f32 %v42_v8, %v32_v4 }
  0x14   :  { %v35_v13 = vadd.f32 %v34_v5, %v33_v10  ;;  %v40_v14 = vadd.f32 %v39_v7, %v38_v11  ;;  %p132_p8 = por %p131_p7, %p130_p6 }
  0x15   :  { %v45_v15 = vadd.f32 %v44_v9, %v43_v12 }
  0x16   :  { %47 = vst [vmem:[#allocation5] sm:$0xff] %v35_v13  ;;  %49 = vst [vmem:[#allocation5 + $0x8] sm:$0xff] %v40_v14  ;;  %p133_p9 = pnand %p132_p8, %p126_p5 }
  0x17   :  { %v46_v16 = vadd.f32 -3.0, %v45_v15 }
  0x19   :  { %51 = vst [vmem:[#allocation5 + $0x10] sm:$0xff] %v46_v16  ;;  %v52_v17 = vsub.f32 0.0, %v46_v16 }
  0x1a   :  { %136 = shalt.err (!%p133_p9)
}
  0x1b   :  { %76 = dma.vmem_to_hbm [thread:$0]  %s71_s17, 384, %s210_s1, [#allocation4], %s172_s12, %s172_s12, %s173_s13   ;;  %v53_v18 = vmax.f32 %v52_v17, 1e-06 }
  0x1c   :  { %s175_s20 = smov [#allocation6]  }
  0x1d   :  { %103 = vrcp.f32 %v53_v18  ;;  %s82_s21 = sshll.u32 %s175_s20, 4  ;;  %s83_s21 = int_to_ptr.vmem [resolvable:$true] %s82_s21 }
  0x1e   :  { %s145_s22 = scalar_lea.vmem %s83_s21, 256  ;;  %p150_p11 = scmp.lt.s32.totalorder %s83_s21, %s83_s21 }
  0x1f   :  { %p146_p10 = scmp.ne.s32.totalorder %s83_s21, %s145_s22  ;;  %p151_p12 = scmp.lt.s32.totalorder %s145_s22, %s145_s22 }
  0x21   :  { %p152_p13 = por %p151_p12, %p150_p11 }
  0x23   :  { %p153_p0 = pnand %p152_p13, %p146_p10 }
  0x2a   :  { %v104_v19 = vpop.eup %103 }
  0x2b   :  { %v56_v20 = vmul.f32 %v104_v19, %v35_v13  ;;  %v60_v21 = vmul.f32 %v104_v19, %v40_v14 }
  0x2d   :  { %v57_v22 = vmul.f32 16.0, %v56_v20  ;;  %v61_v23 = vmul.f32 16.0, %v60_v21 }
  0x2f   :  { %v58_v24 = vadd.f32 8.0, %v57_v22  ;;  %v62_v25 = vadd.f32 8.0, %v61_v23 }
  0x31   :  { %59 = vst [vmem:[#allocation6] sm:$0xff] %v58_v24  ;;  %64 = vst [vmem:[#allocation6 + $0x8] sm:$0xff] %v62_v25 }
  0x32   :  { %156 = shalt.err (!%p153_p0)
}
  0x33   :  { %88 = dma.vmem_to_hbm [thread:$0]  %s83_s21, 256, %s211_s2, [#allocation7], %s172_s12, %s172_s12, %s173_s13  }
  0x34   :  { %167 = dma.done.wait [#allocation4], 384  }
  0x35   :  { %168 = vsyncadd [#allocation4], 4294966912 }
  0x36   :  { %169 = dma.done.wait [#allocation7], 256  }
  0x37   :  { %170 = vsyncadd [#allocation7], 4294967040 }
  0x38   :  { %95 = vsyncpa [#allocation3], 1 }
  0x39   :  { %96 = vsyncpa [#allocation4], 1 }
  0x3a   :  { %97 = vsyncpa [#allocation7], 1 }

</bundles_post_ra>
